<compile_context>
chip_gen: v6e
topology: v6e:2x2x1
jax: 0.10.0
libtpu: 0.0.40
codegen_flags: <defaults>
</compile_context>

<pallas_src>
import jax
import jax.numpy as jnp
import numpy as np
from jax.experimental import pallas as pl
from jax.experimental.pallas import tpu as pltpu


def _make_concat_dma_kernel(flat_sizes):
    """Kernel: one overlapping HBM->HBM async copy per input into its slice."""
    offsets = np.cumsum([0] + list(flat_sizes)).tolist()
    n_in = len(flat_sizes)

    def kernel(*refs):
        in_refs = refs[:n_in]
        out_ref = refs[n_in]
        sem = refs[n_in + 1]

        copies = []
        for i, (src, lo, sz) in enumerate(zip(in_refs, offsets[:-1], flat_sizes)):
            # Static slice of the HBM output ref -> strided DMA descriptor,
            # contiguous per batch row.  No VMEM round-trip, no vector stores.
            cp = pltpu.make_async_copy(src, out_ref.at[:, lo:lo + sz], sem.at[i])
            cp.start()
            copies.append(cp)
        # All DMAs are in flight and overlap across inputs; now drain them.
        for cp in copies:
            cp.wait()

    return kernel


def concat_channels_pallas(xs):
    """Pallas implementation of torch.cat(xs, dim=1) for NCHW tensors."""
    assert len(xs) >= 1
    N, _, H, W = xs[0].shape
    dtype = xs[0].dtype
    for x in xs:
        assert x.ndim == 4 and x.shape[0] == N and x.shape[2:] == (H, W)
        assert x.dtype == dtype
    HW = H * W
    channel_sizes = [int(x.shape[1]) for x in xs]
    c_total = sum(channel_sizes)
    flat_sizes = [c * HW for c in channel_sizes]

    # Flatten (C, H, W) -> C*H*W: pure reshape (row-major, no data movement),
    # makes each input's destination region contiguous within an output row.
    xs_flat = [x.reshape(N, sz) for x, sz in zip(xs, flat_sizes)]

    kernel = _make_concat_dma_kernel(flat_sizes)

    out_flat = pl.pallas_call(
        kernel,
        out_shape=jax.ShapeDtypeStruct((N, c_total * HW), dtype),
        in_specs=[pl.BlockSpec(memory_space=pl.ANY) for _ in xs_flat],
        out_specs=pl.BlockSpec(memory_space=pl.ANY),
        scratch_shapes=[pltpu.SemaphoreType.DMA((len(xs_flat),))],
    )(*xs_flat)

    return out_flat.reshape(N, c_total, H, W)


# Below this total size the fixed pallas_call / DMA-issue overhead dominates
# and XLA's fused concatenate is at least as fast.
_PALLAS_MIN_BYTES = 1 << 20


def concat_channels(xs, *, min_bytes_for_pallas=_PALLAS_MIN_BYTES):
    """Concat.forward equivalent (dim=1) with a size-based dispatch."""
    total_bytes = sum(int(x.size) * x.dtype.itemsize for x in xs)
    if total_bytes < min_bytes_for_pallas:
        # TODO(synk): for tiny feature maps the real win is fusing the concat
        # into the producer kernel's output BlockSpec instead of a copy op.
        return jnp.concatenate(xs, axis=1)
    return concat_channels_pallas(xs)


if __name__ == "__main__":
    key = jax.random.PRNGKey(0)
    k1, k2, k3 = jax.random.split(key, 3)

    # Small NCHW inputs consistent with YOLOv8's channel concat of feature
    # maps with matching spatial dims.
    x1 = jax.random.normal(k1, (2, 4, 16, 16), dtype=jnp.float32)
    x2 = jax.random.normal(k2, (2, 8, 16, 16), dtype=jnp.float32)
    x3 = jax.random.normal(k3, (2, 4, 16, 16), dtype=jnp.float32)

    ref = jnp.concatenate([x1, x2, x3], axis=1)

    # Exercise the Pallas DMA kernel directly (the dispatcher would route
    # shapes this small to jnp.concatenate).
    out = concat_channels_pallas([x1, x2, x3])
    out = jax.block_until_ready(out)
    assert out.shape == ref.shape, (out.shape, ref.shape)
    assert out.dtype == ref.dtype
    np.testing.assert_array_equal(np.asarray(out), np.asarray(ref))

    # Dispatcher path (falls back to the fused XLA concatenate at this size).
    out_small = jax.block_until_ready(concat_channels([x1, x2, x3]))
    np.testing.assert_array_equal(np.asarray(out_small), np.asarray(ref))

    print("KERNEL_OK")
</pallas_src>

<mosaic_0001>
module attributes {stable_mosaic.version = 11 : i64} {
  func.func @kernel(%arg0: memref<2x1024xf32, #tpu.memory_space<any>>, %arg1: memref<2x2048xf32, #tpu.memory_space<any>>, %arg2: memref<2x1024xf32, #tpu.memory_space<any>>, %arg3: memref<2x4096xf32, #tpu.memory_space<any>>, %arg4: memref<3x!tpu.dma_semaphore, #tpu.memory_space<semaphore_mem>>) attributes {dimension_semantics = [], scalar_prefetch = 0 : i64, scratch_operands = 1 : i64, tpu.core_type = #tpu.core_type<tc>} {
    %c0_i32 = arith.constant 0 : i32
    %c0_i32_0 = arith.constant 0 : i32
    %c0_i32_1 = arith.constant 0 : i32
    %0 = tpu.memref_slice %arg3[%c0_i32_0, %c0_i32_1] : memref<2x4096xf32, #tpu.memory_space<any>> -> memref<2x1024xf32, #tpu.memory_space<any>>
    %1 = tpu.memref_slice %arg4[%c0_i32] : memref<3x!tpu.dma_semaphore, #tpu.memory_space<semaphore_mem>> -> memref<1x!tpu.dma_semaphore, #tpu.memory_space<semaphore_mem>>
    %2 = tpu.memref_squeeze %1 : memref<1x!tpu.dma_semaphore, #tpu.memory_space<semaphore_mem>> -> memref<!tpu.dma_semaphore, #tpu.memory_space<semaphore_mem>>
    tpu.enqueue_dma source(%arg0 : memref<2x1024xf32, #tpu.memory_space<any>>) target(%0 : memref<2x1024xf32, #tpu.memory_space<any>>) target_semaphore(%2 : memref<!tpu.dma_semaphore, #tpu.memory_space<semaphore_mem>>)
    %c1_i32 = arith.constant 1 : i32
    %c0_i32_2 = arith.constant 0 : i32
    %c1024_i32 = arith.constant 1024 : i32
    %3 = tpu.memref_slice %arg3[%c0_i32_2, %c1024_i32] : memref<2x4096xf32, #tpu.memory_space<any>> -> memref<2x2048xf32, #tpu.memory_space<any>>
    %4 = tpu.memref_slice %arg4[%c1_i32] : memref<3x!tpu.dma_semaphore, #tpu.memory_space<semaphore_mem>> -> memref<1x!tpu.dma_semaphore, #tpu.memory_space<semaphore_mem>>
    %5 = tpu.memref_squeeze %4 : memref<1x!tpu.dma_semaphore, #tpu.memory_space<semaphore_mem>> -> memref<!tpu.dma_semaphore, #tpu.memory_space<semaphore_mem>>
    tpu.enqueue_dma source(%arg1 : memref<2x2048xf32, #tpu.memory_space<any>>) target(%3 : memref<2x2048xf32, #tpu.memory_space<any>>) target_semaphore(%5 : memref<!tpu.dma_semaphore, #tpu.memory_space<semaphore_mem>>)
    %c2_i32 = arith.constant 2 : i32
    %c0_i32_3 = arith.constant 0 : i32
    %c3072_i32 = arith.constant 3072 : i32
    %6 = tpu.memref_slice %arg3[%c0_i32_3, %c3072_i32] : memref<2x4096xf32, #tpu.memory_space<any>> -> memref<2x1024xf32, #tpu.memory_space<any>>
    %7 = tpu.memref_slice %arg4[%c2_i32] : memref<3x!tpu.dma_semaphore, #tpu.memory_space<semaphore_mem>> -> memref<1x!tpu.dma_semaphore, #tpu.memory_space<semaphore_mem>>
    %8 = tpu.memref_squeeze %7 : memref<1x!tpu.dma_semaphore, #tpu.memory_space<semaphore_mem>> -> memref<!tpu.dma_semaphore, #tpu.memory_space<semaphore_mem>>
    tpu.enqueue_dma source(%arg2 : memref<2x1024xf32, #tpu.memory_space<any>>) target(%6 : memref<2x1024xf32, #tpu.memory_space<any>>) target_semaphore(%8 : memref<!tpu.dma_semaphore, #tpu.memory_space<semaphore_mem>>)
    %c0_i32_4 = arith.constant 0 : i32
    %c0_i32_5 = arith.constant 0 : i32
    %c0_i32_6 = arith.constant 0 : i32
    %9 = tpu.memref_slice %arg3[%c0_i32_5, %c0_i32_6] : memref<2x4096xf32, #tpu.memory_space<any>> -> memref<2x1024xf32, #tpu.memory_space<any>>
    %10 = tpu.memref_slice %arg4[%c0_i32_4] : memref<3x!tpu.dma_semaphore, #tpu.memory_space<semaphore_mem>> -> memref<1x!tpu.dma_semaphore, #tpu.memory_space<semaphore_mem>>
    %11 = tpu.memref_squeeze %10 : memref<1x!tpu.dma_semaphore, #tpu.memory_space<semaphore_mem>> -> memref<!tpu.dma_semaphore, #tpu.memory_space<semaphore_mem>>
    tpu.wait_dma2 semaphore(%11 : memref<!tpu.dma_semaphore, #tpu.memory_space<semaphore_mem>>) src(%arg0 : memref<2x1024xf32, #tpu.memory_space<any>>) dst(%9 : memref<2x1024xf32, #tpu.memory_space<any>>)
    %c1_i32_7 = arith.constant 1 : i32
    %c0_i32_8 = arith.constant 0 : i32
    %c1024_i32_9 = arith.constant 1024 : i32
    %12 = tpu.memref_slice %arg3[%c0_i32_8, %c1024_i32_9] : memref<2x4096xf32, #tpu.memory_space<any>> -> memref<2x2048xf32, #tpu.memory_space<any>>
    %13 = tpu.memref_slice %arg4[%c1_i32_7] : memref<3x!tpu.dma_semaphore, #tpu.memory_space<semaphore_mem>> -> memref<1x!tpu.dma_semaphore, #tpu.memory_space<semaphore_mem>>
    %14 = tpu.memref_squeeze %13 : memref<1x!tpu.dma_semaphore, #tpu.memory_space<semaphore_mem>> -> memref<!tpu.dma_semaphore, #tpu.memory_space<semaphore_mem>>
    tpu.wait_dma2 semaphore(%14 : memref<!tpu.dma_semaphore, #tpu.memory_space<semaphore_mem>>) src(%arg1 : memref<2x2048xf32, #tpu.memory_space<any>>) dst(%12 : memref<2x2048xf32, #tpu.memory_space<any>>)
    %c2_i32_10 = arith.constant 2 : i32
    %c0_i32_11 = arith.constant 0 : i32
    %c3072_i32_12 = arith.constant 3072 : i32
    %15 = tpu.memref_slice %arg3[%c0_i32_11, %c3072_i32_12] : memref<2x4096xf32, #tpu.memory_space<any>> -> memref<2x1024xf32, #tpu.memory_space<any>>
    %16 = tpu.memref_slice %arg4[%c2_i32_10] : memref<3x!tpu.dma_semaphore, #tpu.memory_space<semaphore_mem>> -> memref<1x!tpu.dma_semaphore, #tpu.memory_space<semaphore_mem>>
    %17 = tpu.memref_squeeze %16 : memref<1x!tpu.dma_semaphore, #tpu.memory_space<semaphore_mem>> -> memref<!tpu.dma_semaphore, #tpu.memory_space<semaphore_mem>>
    tpu.wait_dma2 semaphore(%17 : memref<!tpu.dma_semaphore, #tpu.memory_space<semaphore_mem>>) src(%arg2 : memref<2x1024xf32, #tpu.memory_space<any>>) dst(%15 : memref<2x1024xf32, #tpu.memory_space<any>>)
    return
  }
}

</mosaic_0001>

<bundles_post_ra>
// kernel: tpu_custom_call.1
= control target key start
LH: loop header
LB: loop body
LE: loop exit
PB: predicated region body
PF: predicated region fallthrough
CT: control target
= control target key end

     0   :  { %s76_s15 = smov [#allocation2]   ;;  %s77_s16 = smov 131072   ;;  %s119_s0 = inlined_call_operand.hbm [shape: f32[2,1024], index: 0, kind: input, shape index: {}]   ;;  %s120_s3 = inlined_call_operand.hbm [shape: f32[2,4096], index: 3, kind: output, shape index: {}]   ;;  %s121_s1 = inlined_call_operand.hbm [shape: f32[2,2048], index: 1, kind: input, shape index: {}]   ;;  %s122_s2 = inlined_call_operand.hbm [shape: f32[2,1024], index: 2, kind: input, shape index: {}]  }
   0x1   :  { %s15_s14 = scalar_lea.hbm %s120_s3, 256  ;;  %s78_s17 = smov 0  }
   0x2   :  { %14 = dma.general %s119_s0, 256, %s120_s3, %s76_s15, %s77_s16, [#allocation4], %s78_s17, 0  }
   0x3   :  { %s24_s24 = scalar_lea.hbm %s120_s3, 768  ;;  %s79_s25 = smov [#allocation2 + $0x1]  }
   0x4   :  { %23 = dma.general %s121_s1, 512, %s15_s14, %s79_s25, %s77_s16, [#allocation6], %s78_s17, 0  }
   0x5   :  { %s80_s28 = smov [#allocation2 + $0x2]  }
   0x6   :  { %32 = dma.general %s122_s2, 256, %s24_s24, %s80_s28, %s77_s16, [#allocation8], %s78_s17, 0  }
   0x7   :  { %70 = dma.done.wait [#allocation2], 256 }
   0x8   :  { %71 = vsyncadd [#allocation2], 4294967040 }
   0x9   :  { %72 = dma.done.wait [#allocation2 + $0x1], 512 }
   0xa   :  { %73 = vsyncadd [#allocation2 + $0x1], 4294966784 }
   0xb   :  { %74 = dma.done.wait [#allocation2 + $0x2], 256 }
   0xc   :  { %75 = vsyncadd [#allocation2 + $0x2], 4294967040 }
   0xd   :  { %42 = vsyncmov [#allocation2] }
  0x10   :  { %s43_s0 = vpop.sfrf %42 }
  0x11   :  { %p62_p0 = scmp.ne.s32.totalorder %s43_s0, 0 }
  0x13   :  { %47 = shalt.err (%p62_p0)  }
  0x14   :  { %49 = vsyncmov [#allocation2 + $0x1] }
  0x17   :  { %s50_s3 = vpop.sfrf %49 }
  0x18   :  { %p63_p1 = scmp.ne.s32.totalorder %s50_s3, 0 }
  0x1a   :  { %54 = shalt.err (%p63_p1)  }
  0x1b   :  { %56 = vsyncmov [#allocation2 + $0x2] }
  0x1e   :  { %s57_s1 = vpop.sfrf %56 }
  0x1f   :  { %p64_p2 = scmp.ne.s32.totalorder %s57_s1, 0 }
  0x21   :  { %61 = shalt.err (%p64_p2)  }

</bundles_post_ra>
